<compile_context>
chip_gen: v7x
topology: tpu7x:2x2x1
jax: 0.10.0
libtpu: 0.0.40
codegen_flags: <defaults>
</compile_context>

<pallas_src>
import math

import jax
import jax.numpy as jnp
from jax.experimental import pallas as pl
from jax.experimental.pallas import tpu as pltpu

_LANE = 128
_MAX_FOLD_COLS = 4096                     # lane-dense fold target (multiple of 128)
_TARGET_BLOCK_BYTES = 4 * 1024 * 1024     # ~4 MiB / operand / block (2-8 MiB sweet spot)
_MIN_GRID_BLOCKS = 8                      # feed both v7x TCs when data permits
_VMEM_LIMIT_CAP = 32 * 1024 * 1024        # safe scoped-VMEM budget on v5e/v6e/v7x


def _squared_relu_kernel(x_ref, o_ref):
    x = x_ref[...]
    r = jnp.maximum(x, jnp.zeros_like(x))
    o_ref[...] = r * r


def _choose_cols(total: int, last: int) -> int:
    """Largest multiple-of-128 divisor of `total` (capped), else the original last dim."""
    if total % _LANE == 0:
        best = 0
        c = _LANE
        cap = min(total, _MAX_FOLD_COLS)
        while c <= cap:
            if total % c == 0:
                best = c
            c += _LANE
        if best:
            return best
    return last  # correct fallback (masked lane stores if last % 128 != 0)


def _sublane_multiple(itemsize: int) -> int:
    # Sub-32-bit dtypes pack along sublanes: keep row tiles aligned to the pack.
    return {4: 8, 2: 16, 1: 32}.get(itemsize, 8)


def squared_relu(x: jax.Array, *, target_block_bytes: int = _TARGET_BLOCK_BYTES) -> jax.Array:
    """Elementwise relu(x)**2 via a Pallas TPU kernel. Works on any shape/dtype."""
    orig_shape = x.shape
    total = math.prod(orig_shape) if orig_shape else 1
    if total == 0:
        return x
    last = orig_shape[-1] if x.ndim >= 1 else 1
    itemsize = jnp.dtype(x.dtype).itemsize

    cols = _choose_cols(total, last)
    rows = total // cols
    x2d = x.reshape(rows, cols)

    sub = _sublane_multiple(itemsize)
    row_bytes = max(cols * itemsize, 1)

    # Byte-targeted row tile, a multiple of the sublane pack.
    tr = max(sub, (target_block_bytes // row_bytes) // sub * sub)
    # Ensure enough grid blocks for megacore sharding when there is enough data
    # (>= 8 blocks of >= 512 KiB each).
    if rows * row_bytes >= _MIN_GRID_BLOCKS * (512 * 1024):
        tr = min(tr, max(sub, (rows // _MIN_GRID_BLOCKS) // sub * sub))
    tr = min(tr, rows)  # full-dim block when rows is small (keeps (8,128) rule satisfied)

    grid = (pl.cdiv(rows, tr),)
    block_bytes = tr * row_bytes
    # 2 operands x 2 pipeline buffers + headroom, clamped to a cross-gen-safe cap.
    vmem_limit = int(min(_VMEM_LIMIT_CAP, max(16 * 1024 * 1024, 6 * block_bytes)))

    out2d = pl.pallas_call(
        _squared_relu_kernel,
        out_shape=jax.ShapeDtypeStruct((rows, cols), x2d.dtype),
        grid_spec=pltpu.PrefetchScalarGridSpec(
            num_scalar_prefetch=0,
            grid=grid,
            in_specs=[pl.BlockSpec((tr, cols), lambda i: (i, 0))],
            out_specs=pl.BlockSpec((tr, cols), lambda i: (i, 0)),
        ),
        compiler_params=pltpu.CompilerParams(
            dimension_semantics=("parallel",),
            vmem_limit_bytes=vmem_limit,
        ),
        cost_estimate=pl.CostEstimate(
            flops=2 * total,
            transcendentals=0,
            bytes_accessed=2 * total * itemsize,
        ),
    )(x2d)

    return out2d.reshape(orig_shape)
    # TODO(synk): if this op sits next to a matmul in the real model, fuse relu(x)^2
    # into that kernel's epilogue instead of running it standalone (zero extra HBM traffic).


if __name__ == "__main__":
    key = jax.random.PRNGKey(0)

    # Primary case (NCHW-like), exercises the lane-dense fold path: 2048 elems -> (1, 2048).
    x = jax.random.normal(key, (2, 4, 16, 16), dtype=jnp.float32)
    y = squared_relu(x)
    jax.block_until_ready(y)
    y_ref = jnp.square(jnp.maximum(x, 0.0))
    assert y.shape == x.shape and y.dtype == x.dtype
    assert jnp.allclose(y, y_ref, atol=1e-6, rtol=1e-6)

    # Fallback path: total not divisible by 128 (keeps original last dim, still correct).
    x2 = jax.random.normal(jax.random.fold_in(key, 1), (2, 3, 7, 5), dtype=jnp.float32)
    y2 = squared_relu(x2)
    jax.block_until_ready(y2)
    assert jnp.allclose(y2, jnp.square(jnp.maximum(x2, 0.0)), atol=1e-6, rtol=1e-6)

    print("KERNEL_OK")
</pallas_src>

<mosaic_0001>
module attributes {stable_mosaic.version = 11 : i64} {
  func.func @_squared_relu_kernel(%arg0: i32, %arg1: memref<1x2048xf32, #tpu.memory_space<vmem>>, %arg2: memref<1x2048xf32, #tpu.memory_space<vmem>>) attributes {dimension_semantics = [#tpu.dimension_semantics<parallel>], iteration_bounds = array<i64: 1>, scalar_prefetch = 0 : i64, scratch_operands = 0 : i64, tpu.core_type = #tpu.core_type<tc>, window_params = [{transform_indices = @transform_0, window_bounds = array<i64: 1, 2048>}, {transform_indices = @transform_1, window_bounds = array<i64: 1, 2048>}]} {
    %c0 = arith.constant 0 : index
    %c0_0 = arith.constant 0 : index
    %0 = vector.load %arg1[%c0, %c0_0] : memref<1x2048xf32, #tpu.memory_space<vmem>>, vector<1x2048xf32>
    %cst = arith.constant 0.000000e+00 : f32
    %1 = vector.broadcast %cst : f32 to vector<1x2048xf32>
    %2 = arith.maximumf %0, %1 : vector<1x2048xf32>
    %3 = arith.mulf %2, %2 : vector<1x2048xf32>
    %c0_1 = arith.constant 0 : index
    %c0_2 = arith.constant 0 : index
    %4 = vector.load %arg2[%c0_1, %c0_2] : memref<1x2048xf32, #tpu.memory_space<vmem>>, vector<1x2048xf32>
    tpu.vector_store %arg2[%c0_1, %c0_2], %3 {strides = array<i32>} : memref<1x2048xf32, #tpu.memory_space<vmem>>, vector<1x2048xf32>,
    return
  }
  func.func @transform_0(%arg0: i32) -> (i32, i32) {
    %c0_i32 = arith.constant 0 : i32
    %c0_i32_0 = arith.constant 0 : i32
    return %arg0, %c0_i32 : i32, i32
  }
  func.func @transform_1(%arg0: i32) -> (i32, i32) {
    %c0_i32 = arith.constant 0 : i32
    %c0_i32_0 = arith.constant 0 : i32
    return %arg0, %c0_i32 : i32, i32
  }
}

</mosaic_0001>

<bundles_post_ra>
// kernel: tpu_custom_call.1
= control target key start
LH: loop header
LB: loop body
LE: loop exit
PB: predicated region body
PF: predicated region fallthrough
CT: control target
= control target key end

     0   :  { %6 = vsyncpa [#allocation3], 0  ;;  %s130_s0 = inlined_call_operand.hbm [shape: f32[1,2048], index: 0, kind: input, shape index: {}]   ;;  %s131_s1 = inlined_call_operand.hbm [shape: f32[1,2048], index: 1, kind: output, shape index: {}]  }
   0x1   :  { %7 = vsyncpa [#allocation4], 0  ;;  %s94_s6 = smov [#allocation2]   ;;  %s46_s10 = scalar_lea.hbm %s130_s0, 256 }
   0x2   :  { %s14_s7 = sshll.u32 %s94_s6, 4  ;;  %p47_p0 = scmp.ne.s32.totalorder %s130_s0, %s46_s10  ;;  %s15_s7 = int_to_ptr.vmem [resolvable:$true] %s14_s7 }
   0x3   :  { %p50_p1 = scmp.lt.u32.totalorder %s46_s10, %s130_s0 }
   0x5   :  { %p52_p2 = pnand %p50_p1, %p47_p0 }
   0x7   :  { %55 = shalt.err (!%p52_p2)
}
   0x8   :  { %s56_s15 = scalar_lea.vmem %s15_s7, 256  ;;  %p61_p4 = scmp.lt.s32.totalorder %s15_s7, %s15_s7 }
   0x9   :  { %p57_p3 = scmp.ne.s32.totalorder %s15_s7, %s56_s15  ;;  %p62_p5 = scmp.lt.s32.totalorder %s56_s15, %s56_s15 }
   0xb   :  { %p63_p6 = por %p62_p5, %p61_p4 }
   0xd   :  { %p64_p7 = pnand %p63_p6, %p57_p3 }
   0xf   :  { %67 = shalt.err (!%p64_p7)
}
  0x10   :  { %17 = dma.hbm_to_vmem [thread:$0]  %s130_s0, 256, %s15_s7, [#allocation3]  }
  0x11   :  { %90 = dma.done.wait [#allocation3], 256  }
  0x12   :  { %91 = vsyncadd [#allocation3], 4294967040  ;;  %v21_v0 = vld [vmem:[#allocation2] sm:$0xff]  ;;  %v22_v1 = vld [vmem:[#allocation2 + $0x8] sm:$0xff]  ;;  %s95_s18 = smov [#allocation5]  }
  0x13   :  { %s35_s19 = sshll.u32 %s95_s18, 4  ;;  %v23_v2 = vmax.f32 %v21_v0, 0.0  ;;  %v24_v3 = vmax.f32 %v22_v1, 0.0  ;;  %s36_s19 = int_to_ptr.vmem [resolvable:$true] %s35_s19 }
  0x14   :  { %s68_s20 = scalar_lea.vmem %s36_s19, 256  ;;  %p73_p9 = scmp.lt.s32.totalorder %s36_s19, %s36_s19 }
  0x15   :  { %v25_v4 = vmul.f32 %v23_v2, %v23_v2  ;;  %v26_v5 = vmul.f32 %v24_v3, %v24_v3  ;;  %p69_p8 = scmp.ne.s32.totalorder %s36_s19, %s68_s20  ;;  %p74_p10 = scmp.lt.s32.totalorder %s68_s20, %s68_s20 }
  0x17   :  { %27 = vst [vmem:[#allocation5] sm:$0xff] %v25_v4  ;;  %28 = vst [vmem:[#allocation5 + $0x8] sm:$0xff] %v26_v5  ;;  %p75_p11 = por %p74_p10, %p73_p9 }
  0x19   :  { %p76_p12 = pnand %p75_p11, %p69_p8 }
  0x1b   :  { %79 = shalt.err (!%p76_p12)
}
  0x1c   :  { %s80_s22 = scalar_lea.hbm %s131_s1, 256 }
  0x1d   :  { %p81_p13 = scmp.ne.s32.totalorder %s131_s1, %s80_s22  ;;  %p84_p0 = scmp.lt.u32.totalorder %s80_s22, %s131_s1 }
  0x1f   :  { %p86_p1 = pnand %p84_p0, %p81_p13 }
  0x21   :  { %89 = shalt.err (!%p86_p1)
}
  0x22   :  { %38 = dma.vmem_to_hbm [thread:$0]  %s36_s19, 256, %s131_s1, [#allocation4]  }
  0x23   :  { %92 = dma.done.wait [#allocation4], 256  }
  0x24   :  { %93 = vsyncadd [#allocation4], 4294967040 }
  0x25   :  { %42 = vsyncpa [#allocation3], 1 }
  0x26   :  { %43 = vsyncpa [#allocation4], 1 }

</bundles_post_ra>
